<compile_context>
chip_gen: v5e
topology: v5e:2x2
jax: 0.10.0
libtpu: 0.0.40
codegen_flags: <defaults>
</compile_context>

<pallas_src>
import functools
import math

import jax
import jax.numpy as jnp
from jax.experimental import pallas as pl
from jax.experimental.pallas import tpu as pltpu

_LANE = 128     # lane width (last dim)
_SUBLANE = 8    # f32 sublane count (second-to-last dim)


def _round_up(x, m):
    return ((x + m - 1) // m) * m


def _mlp_kernel(*refs, num_layers, activation):
    """refs = (x_ref, w0, b0, w1, b1, ..., w_{L-1}, b_{L-1}, o_ref).

    x_ref: (TM, K); w_l: (Kin_l, H_pad) in bf16; b_l: (1, H_pad) f32;
    o_ref: (TM, H_pad). Matmuls feed the MXU in bf16 and accumulate in f32;
    bias + activation run in f32 on the VPU/EUP.
    """
    x_ref = refs[0]
    o_ref = refs[-1]

    h = x_ref[...].astype(jnp.float32)
    for l in range(num_layers):            # static unroll over layers
        w_ref = refs[1 + 2 * l]
        b_ref = refs[2 + 2 * l]
        y = jnp.dot(h.astype(w_ref.dtype), w_ref[...],
                    preferred_element_type=jnp.float32)
        y = y + b_ref[...]                 # bias broadcast over rows (f32)
        if activation == "relu":
            h = jnp.maximum(y, 0.0)
        elif activation == "sigmoid":
            h = jax.nn.sigmoid(y)          # EUP path
        elif activation == "tanh":
            h = jnp.tanh(y)                # EUP path
        else:
            raise ValueError(f"unknown activation {activation}")
    o_ref[...] = h.astype(o_ref.dtype)


def init_mlp_params(key, config):
    """nn.Linear-style init (uniform +-1/sqrt(fan_in)); weights stored as
    (in_features, out_features) so the kernel computes x @ W + b."""
    params = []
    for i in range(config["num_layers"]):
        out_features = config["hidden_size"]
        in_features = config["input_size"] if i == 0 else out_features
        key, kw, kb = jax.random.split(key, 3)
        bound = 1.0 / math.sqrt(in_features)
        w = jax.random.uniform(kw, (in_features, out_features),
                               jnp.float32, -bound, bound)
        b = jax.random.uniform(kb, (out_features,), jnp.float32, -bound, bound)
        params.append((w, b))
    return params


def pad_params(params, weight_dtype=jnp.bfloat16):
    """Prepare layer params for the kernel:
      * output (lane) dim zero-padded to a multiple of 128 (lane-dense stores),
      * contraction dim of layers >0 padded to match the previous layer's
        padded output; layer 0 keeps its native K (no input padding needed),
      * weights cast to bf16, biases kept f32 as (1, H_pad).
    Padded rows/cols are exactly zero so padded lanes (even through
    sigmoid/tanh) never leak into real outputs."""
    padded = []
    for idx, (w, b) in enumerate(params):
        kin, nout = w.shape
        kin_p = kin if idx == 0 else _round_up(kin, _LANE)
        nout_p = _round_up(nout, _LANE)
        w_p = (jnp.zeros((kin_p, nout_p), weight_dtype)
               .at[:kin, :nout].set(w.astype(weight_dtype)))
        b_p = jnp.zeros((1, nout_p), jnp.float32).at[0, :nout].set(b)
        padded.append((w_p, b_p))
    return padded


def _pick_tm(m_pad):
    """Batch tile: target 256 rows (fills the 256-wide MXU on v6e/v7x and
    amortizes the ~0.35us per-grid-step overhead); split small batches into
    two tiles so the parallel grid axis can engage v7x's second core."""
    if m_pad <= _SUBLANE:
        return m_pad
    if m_pad <= 512:
        return _round_up(pl.cdiv(m_pad, 2), _SUBLANE)
    return 256


def mlp_forward(x, padded_params, activation, out_features):
    """Fused MLP forward: one pallas_call for all layers."""
    M, K = x.shape
    num_layers = len(padded_params)
    H_pad = padded_params[-1][0].shape[1]

    # Batch tiling / padding (only along M; K stays native).
    M_pad = _round_up(max(M, _SUBLANE), _SUBLANE)
    TM = _pick_tm(M_pad)
    M_pad = _round_up(M_pad, TM)
    grid = (M_pad // TM,)

    x_p = x if M_pad == M else jnp.pad(x, ((0, M_pad - M), (0, 0)))

    flat_inputs = [x_p]
    in_specs = [pl.BlockSpec((TM, K), lambda i: (i, 0))]
    for w_p, b_p in padded_params:
        flat_inputs.append(w_p)
        flat_inputs.append(b_p)
        # Constant index_map + single buffering: weights/biases are DMA'd once
        # and stay VMEM-resident (no 2x double-buffer copy) across batch tiles.
        in_specs.append(pl.BlockSpec(w_p.shape, lambda i: (0, 0),
                                     pipeline_mode=pl.Buffered(1)))
        in_specs.append(pl.BlockSpec(b_p.shape, lambda i: (0, 0),
                                     pipeline_mode=pl.Buffered(1)))

    # --- VMEM budget: single-buffered weights/biases + double-buffered x/out
    # tiles + f32 intermediates, with ~50% headroom (capped for v7x's 64 MiB).
    weight_bytes = sum(w.size * w.dtype.itemsize + b.size * b.dtype.itemsize
                       for w, b in padded_params)
    io_bytes = 2 * TM * K * x.dtype.itemsize + 2 * TM * H_pad * x.dtype.itemsize
    interm_bytes = 4 * TM * H_pad * 4
    vmem_limit = int(1.5 * (weight_bytes + io_bytes + interm_bytes)) + (2 << 20)
    vmem_limit = min(max(vmem_limit, 16 << 20), 64 << 20)

    # --- Cost estimate for XLA's scheduler around the custom call.
    flops = 2 * M_pad * sum(int(w.shape[0]) * int(w.shape[1])
                            for w, _ in padded_params)
    transcendentals = (0 if activation == "relu"
                       else M_pad * sum(int(w.shape[1]) for w, _ in padded_params))
    bytes_accessed = (x_p.size * x_p.dtype.itemsize + weight_bytes
                      + M_pad * H_pad * x.dtype.itemsize)
    cost = pl.CostEstimate(flops=flops, transcendentals=transcendentals,
                           bytes_accessed=bytes_accessed)

    kernel = functools.partial(_mlp_kernel, num_layers=num_layers,
                               activation=activation)

    out_p = pl.pallas_call(
        kernel,
        out_shape=jax.ShapeDtypeStruct((M_pad, H_pad), x.dtype),
        grid=grid,
        in_specs=in_specs,
        out_specs=pl.BlockSpec((TM, H_pad), lambda i: (i, 0)),
        compiler_params=pltpu.CompilerParams(
            dimension_semantics=("parallel",),   # shards batch tiles on v7x's 2 TCs
            vmem_limit_bytes=vmem_limit),
        cost_estimate=cost,
    )(*flat_inputs)

    # Strip batch and feature padding.
    return out_p[:M, :out_features]


def _reference_forward(x, params, activation):
    act = {"relu": lambda v: jnp.maximum(v, 0.0),
           "sigmoid": jax.nn.sigmoid,
           "tanh": jnp.tanh}[activation]
    h = x
    for w, b in params:
        h = act(h @ w + b)
    return h


if __name__ == "__main__":
    config = {
        "input_size": 32,
        "hidden_size": 32,
        "num_layers": 2,
        "activation": "relu",
    }
    batch = 8

    key = jax.random.PRNGKey(0)
    key, kx = jax.random.split(key)
    x = jax.random.normal(kx, (batch, config["input_size"]), jnp.float32)

    params = init_mlp_params(key, config)
    padded_params = pad_params(params)          # bf16 weights, f32 biases

    ok = True
    for act_name in ("relu", "sigmoid", "tanh"):
        out = mlp_forward(x, padded_params, act_name, config["hidden_size"])
        out = jax.block_until_ready(out)
        ref = _reference_forward(x, params, act_name)   # f32 reference
        ok &= out.shape == (batch, config["hidden_size"])
        # bf16 weights -> small numeric drift vs the f32 reference.
        ok &= bool(jnp.allclose(out, ref, atol=2e-2, rtol=2e-2))

    assert ok
    print("KERNEL_OK")
</pallas_src>

<mosaic_0001>
module attributes {stable_mosaic.version = 11 : i64} {
  func.func @_mlp_kernel(%arg0: i32, %arg1: memref<8x32xf32, #tpu.memory_space<vmem>>, %arg2: memref<32x128xbf16, #tpu.memory_space<vmem>>, %arg3: memref<1x128xf32, #tpu.memory_space<vmem>>, %arg4: memref<128x128xbf16, #tpu.memory_space<vmem>>, %arg5: memref<1x128xf32, #tpu.memory_space<vmem>>, %arg6: memref<8x128xf32, #tpu.memory_space<vmem>>) attributes {dimension_semantics = [#tpu.dimension_semantics<parallel>], iteration_bounds = array<i64: 1>, scalar_prefetch = 0 : i64, scratch_operands = 0 : i64, tpu.core_type = #tpu.core_type<tc>, window_params = [{transform_indices = @transform_0, window_bounds = array<i64: 8, 32>}, {pipeline_mode = #tpu.pipeline_mode<synchronous>, transform_indices = @transform_1, window_bounds = array<i64: 32, 128>}, {pipeline_mode = #tpu.pipeline_mode<synchronous>, transform_indices = @transform_2, window_bounds = array<i64: 1, 128>}, {pipeline_mode = #tpu.pipeline_mode<synchronous>, transform_indices = @transform_3, window_bounds = array<i64: 128, 128>}, {pipeline_mode = #tpu.pipeline_mode<synchronous>, transform_indices = @transform_4, window_bounds = array<i64: 1, 128>}, {transform_indices = @transform_5, window_bounds = array<i64: 8, 128>}]} {
    %c0 = arith.constant 0 : index
    %c0_0 = arith.constant 0 : index
    %0 = vector.load %arg1[%c0, %c0_0] : memref<8x32xf32, #tpu.memory_space<vmem>>, vector<8x32xf32>
    %1 = arith.truncf %0 : vector<8x32xf32> to vector<8x32xbf16>
    %c0_1 = arith.constant 0 : index
    %c0_2 = arith.constant 0 : index
    %2 = vector.load %arg2[%c0_1, %c0_2] : memref<32x128xbf16, #tpu.memory_space<vmem>>, vector<32x128xbf16>
    %cst = arith.constant dense<0.000000e+00> : vector<8x128xf32>
    %3 = tpu.matmul %1, %2, %cst {dimension_numbers = #tpu.dot_dimension_numbers<[1], [0], [0], [1], [0, 0, 1, 1], [], []>} : vector<8x32xbf16>, vector<32x128xbf16>, vector<8x128xf32> -> vector<8x128xf32>
    %c0_3 = arith.constant 0 : index
    %c0_4 = arith.constant 0 : index
    %4 = vector.load %arg3[%c0_3, %c0_4] : memref<1x128xf32, #tpu.memory_space<vmem>>, vector<1x128xf32>
    %5 = vector.broadcast %4 : vector<1x128xf32> to vector<8x128xf32>
    %6 = arith.addf %3, %5 : vector<8x128xf32>
    %cst_5 = arith.constant 0.000000e+00 : f32
    %7 = vector.broadcast %cst_5 : f32 to vector<8x128xf32>
    %8 = arith.maximumf %6, %7 : vector<8x128xf32>
    %9 = arith.truncf %8 : vector<8x128xf32> to vector<8x128xbf16>
    %c0_6 = arith.constant 0 : index
    %c0_7 = arith.constant 0 : index
    %10 = vector.load %arg4[%c0_6, %c0_7] : memref<128x128xbf16, #tpu.memory_space<vmem>>, vector<128x128xbf16>
    %cst_8 = arith.constant dense<0.000000e+00> : vector<8x128xf32>
    %11 = tpu.matmul %9, %10, %cst_8 {dimension_numbers = #tpu.dot_dimension_numbers<[1], [0], [0], [1], [0, 0, 1, 1], [], []>} : vector<8x128xbf16>, vector<128x128xbf16>, vector<8x128xf32> -> vector<8x128xf32>
    %c0_9 = arith.constant 0 : index
    %c0_10 = arith.constant 0 : index
    %12 = vector.load %arg5[%c0_9, %c0_10] : memref<1x128xf32, #tpu.memory_space<vmem>>, vector<1x128xf32>
    %13 = vector.broadcast %12 : vector<1x128xf32> to vector<8x128xf32>
    %14 = arith.addf %11, %13 : vector<8x128xf32>
    %cst_11 = arith.constant 0.000000e+00 : f32
    %15 = vector.broadcast %cst_11 : f32 to vector<8x128xf32>
    %16 = arith.maximumf %14, %15 : vector<8x128xf32>
    %c0_12 = arith.constant 0 : index
    %c0_13 = arith.constant 0 : index
    %17 = vector.load %arg6[%c0_12, %c0_13] : memref<8x128xf32, #tpu.memory_space<vmem>>, vector<8x128xf32>
    tpu.vector_store %arg6[%c0_12, %c0_13], %16 {strides = array<i32>} : memref<8x128xf32, #tpu.memory_space<vmem>>, vector<8x128xf32>,
    return
  }
  func.func @transform_0(%arg0: i32) -> (i32, i32) {
    %c0_i32 = arith.constant 0 : i32
    %c0_i32_0 = arith.constant 0 : i32
    return %arg0, %c0_i32 : i32, i32
  }
  func.func @transform_1(%arg0: i32) -> (i32, i32) {
    %c0_i32 = arith.constant 0 : i32
    %c0_i32_0 = arith.constant 0 : i32
    %c0_i32_1 = arith.constant 0 : i32
    return %c0_i32, %c0_i32_0 : i32, i32
  }
  func.func @transform_2(%arg0: i32) -> (i32, i32) {
    %c0_i32 = arith.constant 0 : i32
    %c0_i32_0 = arith.constant 0 : i32
    %c0_i32_1 = arith.constant 0 : i32
    return %c0_i32, %c0_i32_0 : i32, i32
  }
  func.func @transform_3(%arg0: i32) -> (i32, i32) {
    %c0_i32 = arith.constant 0 : i32
    %c0_i32_0 = arith.constant 0 : i32
    %c0_i32_1 = arith.constant 0 : i32
    return %c0_i32, %c0_i32_0 : i32, i32
  }
  func.func @transform_4(%arg0: i32) -> (i32, i32) {
    %c0_i32 = arith.constant 0 : i32
    %c0_i32_0 = arith.constant 0 : i32
    %c0_i32_1 = arith.constant 0 : i32
    return %c0_i32, %c0_i32_0 : i32, i32
  }
  func.func @transform_5(%arg0: i32) -> (i32, i32) {
    %c0_i32 = arith.constant 0 : i32
    %c0_i32_0 = arith.constant 0 : i32
    return %arg0, %c0_i32 : i32, i32
  }
}

</mosaic_0001>

<bundles_post_ra>
// kernel: tpu_custom_call.1
= control target key start
LH: loop header
LB: loop body
LE: loop exit
PB: predicated region body
PF: predicated region fallthrough
CT: control target
= control target key end

     0   :  { %10 = vsyncpa [#allocation3], 0  ;;  %s424_s0 = inlined_call_operand.hbm [shape: f32[8,32], index: 0, kind: input, shape index: {}]   ;;  %s425_s1 = inlined_call_operand.hbm [shape: bf16[32,128], index: 1, kind: input, shape index: {}]   ;;  %s426_s2 = inlined_call_operand.vmem [shape: f32[1,128], index: 2, kind: input, shape index: {}]   ;;  %s427_s3 = inlined_call_operand.hbm [shape: bf16[128,128], index: 3, kind: input, shape index: {}]   ;;  %s428_s4 = inlined_call_operand.vmem [shape: f32[1,128], index: 4, kind: input, shape index: {}]   ;;  %s429_s5 = inlined_call_operand.hbm [shape: f32[8,128], index: 5, kind: output, shape index: {}]  }
   0x1   :  { %11 = vsyncpa [#allocation6], 0  ;;  %s28_s20 = sshll.u32 %s425_s1, 4  ;;  %s29_s20 = int_to_ptr.hbm [resolvable:$true] %s28_s20 }
   0x2   :  { %12 = vsyncpa [#allocation4], 0  ;;  %s370_s21 = smov [#allocation5]   ;;  %s18_s25 = sshll.u32 %s424_s0, 4  ;;  %s19_s25 = int_to_ptr.hbm [resolvable:$true] %s18_s25 }
   0x3   :  { %s30_s22 = sshll.u32 %s370_s21, 4  ;;  %s371_s26 = smov 64   ;;  %s31_s22 = int_to_ptr.vmem [resolvable:$true] %s30_s22 }
   0x4   :  { %s372_s27 = smov 4   ;;  %s373_s28 = smov [#allocation2]  }
   0x5   :  { %36 = dma.hbm_to_vmem [thread:$0]  %s29_s20, 256, %s31_s22, [#allocation6], %s371_s26, %s371_s26, %s372_s27  }
   0x6   :  { %s20_s29 = sshll.u32 %s373_s28, 4  ;;  %s43_s7 = sshll.u32 %s427_s3, 4  ;;  %s21_s29 = int_to_ptr.vmem [resolvable:$true] %s20_s29  ;;  %s44_s7 = int_to_ptr.hbm [resolvable:$true] %s43_s7 }
   0x7   :  { %23 = dma.hbm_to_vmem [thread:$0]  %s19_s25, 128, %s21_s29, [#allocation3]  }
   0x8   :  { %s374_s1 = smov [#allocation7]  }
   0x9   :  { %s45_s8 = sshll.u32 %s374_s1, 4  ;;  %s46_s8 = int_to_ptr.vmem [resolvable:$true] %s45_s8 }
   0xa   :  { %51 = dma.hbm_to_vmem [thread:$0]  %s44_s7, 1024, %s46_s8, [#allocation6], %s371_s26, %s371_s26, %s372_s27  }
   0xb   :  { %364 = dma.done.wait [#allocation3], 128  }
   0xc   :  { %365 = vsyncadd [#allocation3], 4294967168 }
   0xd   :  { %366 = dma.done.wait [#allocation6], 1280  }
   0xe   :  { %367 = vsyncadd [#allocation6], 4294966016  ;;  %v251_v0 = vld [vmem:[#allocation5 + $0x8] sm:$0xff]  ;;  %v250_v2 = vld [vmem:[#allocation5] sm:$0xff]  ;;  %vm89_vm0 = vcmask 261120   ;;  %s375_s11 = smov [#allocation8]  }
   0xf   :  { %v259_v1 = vld [vmem:[#allocation7 + $0x38] sm:$0xff]  ;;  %99 = vmatpush.bf16.msra.mxu0 %v251_v0  ;;  %v67_v3 = vld [vmem:[#allocation2] sm:$0xff]  ;;  %v258_v4 = vld [vmem:[#allocation7 + $0x30] sm:$0xff]  ;;  %s196_s12 = sshll.u32 %s375_s11, 4  ;;  %s198_s15 = sshll.u32 %s429_s5, 4  ;;  %s197_s12 = int_to_ptr.vmem [resolvable:$true] %s196_s12  ;;  %s199_s15 = int_to_ptr.hbm [resolvable:$true] %s198_s15 }
  0x10   :  { %176 = vmatpush.bf16.msra.mxu1 %v259_v1  ;;  %v68_v5 = vpack.c.bf16 %v67_v3, %v67_v3  ;;  %v257_v6 = vld [vmem:[#allocation7 + $0x28] sm:$0xff]  ;;  %v256_v7 = vld [vmem:[#allocation7 + $0x20] sm:$0xff]  ;;  %v255_v8 = vld [vmem:[#allocation7 + $0x18] sm:$0xff] }
  0x11   :  { %v254_v9 = vld [vmem:[#allocation7 + $0x10] sm:$0xff]  ;;  %v253_v10 = vld [vmem:[#allocation7 + $0x8] sm:$0xff]  ;;  %v252_v11 = vld [vmem:[#allocation7] sm:$0xff] }
  0x12   :  { %v266_v12 = vld [vmem:[%s426_s2] ss:$0 sm:$0xff] }
  0x13   :  { %100 = vmatpush.bf16.msra.mxu0 %v250_v2  ;;  %v267_v18 = vld [vmem:[%s428_s4] ss:$0 sm:$0xff] }
  0x14   :  { %177 = vmatpush.bf16.msra.mxu1 %v258_v4 }
  0x16   :  { %217 = vmatmul.msk.bf16.vlgmr.msra.gmra.mxu0 %vm89_vm0, %v68_v5 }
  0x18   :  { %178 = vmatpush.bf16.msra.mxu1 %v257_v6 }
  0x1c   :  { %179 = vmatpush.bf16.msra.mxu1 %v256_v7 }
  0x20   :  { %180 = vmatpush.bf16.msra.mxu1 %v255_v8 }
  0x24   :  { %181 = vmatpush.bf16.msra.mxu1 %v254_v9 }
  0x28   :  { %182 = vmatpush.bf16.msra.mxu1 %v253_v10 }
  0x2c   :  { %183 = vmatpush.bf16.msra.mxu1 %v252_v11 }
  0x93   :  { %v102_v13 = vpop.f32.mrf.mxu0 }
  0x94   :  { %v103_v14 = vadd.f32 %v266_v12, %v102_v13 }
  0x96   :  { %v106_v15 = vmax.f32 %v103_v14, 0.0 }
  0x98   :  { %v107_v16 = vpack.c.bf16 %v106_v15, %v106_v15 }
  0x9a   :  { %184 = vmatmul.bf16.vlgmr.msra.gmra.mxu1 %v107_v16 }
  0x9b   :  { %v104_v17 = vpop.f32.mrf.mxu0 }
 0x117   :  { %v185_v19 = vpop.f32.mrf.mxu1 }
 0x118   :  { %v186_v20 = vadd.f32 %v267_v18, %v185_v19 }
 0x11a   :  { %v189_v21 = vmax.f32 %v186_v20, 0.0 }
 0x11c   :  { %190 = vst [vmem:[#allocation8] sm:$0xff] %v189_v21 }
 0x11d   :  { %201 = dma.vmem_to_hbm [thread:$0]  %s197_s12, 128, %s199_s15, [#allocation4]  }
 0x11f   :  { %v187_v22 = vpop.f32.mrf.mxu1 }
 0x120   :  { %368 = dma.done.wait [#allocation4], 128  }
 0x121   :  { %369 = vsyncadd [#allocation4], 4294967168 }
 0x122   :  { %206 = vsyncpa [#allocation3], 1 }
 0x123   :  { %207 = vsyncpa [#allocation6], 1 }
 0x124   :  { %208 = vsyncpa [#allocation4], 1 }

</bundles_post_ra>
